<compile_context>
chip_gen: v7x
topology: tpu7x:2x2x1
jax: 0.10.0
libtpu: 0.0.40
codegen_flags: <defaults>
</compile_context>

<pallas_src>
import numpy as np
import jax
import jax.numpy as jnp
from jax import lax
from jax.experimental import pallas as pl
from jax.experimental.pallas import tpu as pltpu


def _interp_matrix_align_corners(n_in, n_out):
    """Row interpolation matrix matching F.interpolate(mode='bilinear', align_corners=True)."""
    A = np.zeros((n_out, n_in), dtype=np.float32)
    if n_in == 1 or n_out == 1:
        A[:, 0] = 1.0
        return A
    scale = (n_in - 1) / (n_out - 1)
    for p in range(n_out):
        src = p * scale
        i0 = min(int(np.floor(src)), n_in - 1)
        i1 = min(i0 + 1, n_in - 1)
        w = src - i0
        A[p, i0] += 1.0 - w
        A[p, i1] += w
    return A


def _make_up_kernel(H, W, Cin, Cmid, Cout):
    H2, W2 = 2 * H, 2 * W
    WC2_mid = W2 * Cmid

    def kernel(x_ref, ash_ref, c1_ref, s1_ref, t1_ref,
               b2_ref, s2_ref, t2_ref, o_ref, pad_ref):
        x = x_ref[0]                                                      # (H, W*Cin)

        # ---- fused bilinear upsample + conv1 (+ folded BN, ReLU) ----
        # z1 = sum_ky A_h_shift[ky] @ x @ C1[ky]   (all weight factors precomputed)
        z1 = None
        for ky in range(3):
            t = jnp.dot(x, c1_ref[ky],
                        preferred_element_type=jnp.float32)              # (H, W2*Cmid)
            term = jnp.dot(ash_ref[ky], t,
                           preferred_element_type=jnp.float32)           # (H2, W2*Cmid)
            z1 = term if z1 is None else z1 + term
        h = jnp.maximum(z1 * s1_ref[...] + t1_ref[...], 0.0)             # (H2, W2*Cmid)

        # ---- conv2: H zero-pad via small VMEM scratch, 3 ky-tap matmuls ----
        pad_ref[0:1, :] = jnp.zeros((1, WC2_mid), jnp.float32)
        pad_ref[H2 + 1:H2 + 2, :] = jnp.zeros((1, WC2_mid), jnp.float32)
        pad_ref[1:H2 + 1, :] = h

        z2 = None
        for ky in range(3):
            term = jnp.dot(pad_ref[ky:ky + H2, :], b2_ref[ky],
                           preferred_element_type=jnp.float32)           # (H2, W2*Cout)
            z2 = term if z2 is None else z2 + term
        out = jnp.maximum(z2 * s2_ref[...] + t2_ref[...], 0.0)

        o_ref[0] = out.astype(o_ref.dtype)                               # lane-dense store

    return kernel


def up_forward(x_nchw, params, eps=1e-5):
    """Up.forward (bilinear=True).  x_nchw: (N, Cin, H, W) float32 -> (N, Cout, 2H, 2W)."""
    N, Cin, H, W = x_nchw.shape
    w1, b1c, g1, be1, mu1, v1 = params["conv1"]
    w2, b2c, g2, be2, mu2, v2 = params["conv2"]
    Cmid, Cout = w1.shape[-1], w2.shape[-1]
    H2, W2 = 2 * H, 2 * W

    # --- glue: fold (W, C) onto the lane axis ---
    x_f = jnp.transpose(x_nchw, (0, 2, 3, 1)).reshape(N, H, W * Cin)

    # --- host-side constants: separable interp matrices + ky-shift fold ---
    A_h = _interp_matrix_align_corners(H, H2)                                    # (H2, H)
    A_w = _interp_matrix_align_corners(W, W2)                                    # (W2, W)
    Bw_up = np.kron(A_w.T, np.eye(Cin, dtype=np.float32))                        # (W*Cin, W2*Cin)

    # A_h with the conv1 ky H-shift (and zero H-padding) folded in:
    #   A_sh[ky][p, :] = A_h[p + ky - 1, :]   (zero row when out of range)
    A_sh = np.zeros((3, H2, H), np.float32)
    A_sh[0, 1:] = A_h[:H2 - 1]
    A_sh[1] = A_h
    A_sh[2, :H2 - 1] = A_h[1:]

    # banded conv matrices: kx taps + W zero-padding folded in, one slab per ky tap.
    # P[kx, wi, wo] = 1  iff  wi == wo + kx - 1  (valid tap)
    P = jnp.asarray(np.stack([np.eye(W2, k=1 - kx, dtype=np.float32) for kx in range(3)]))
    B1 = jnp.einsum('xab,yxio->yaibo', P, w1).reshape(3, W2 * Cin, W2 * Cmid)
    B2 = jnp.einsum('xab,yxio->yaibo', P, w2).reshape(3, W2 * Cmid, W2 * Cout)
    # fuse the W-direction upsample into the conv1 banded matrix
    C1 = jnp.einsum('ij,yjk->yik', jnp.asarray(Bw_up), B1)                       # (3, W*Cin, W2*Cmid)

    # folded BatchNorm (inference) scale/shift (+conv bias), tiled along folded lane axis
    inv1 = g1 / jnp.sqrt(v1 + eps)
    inv2 = g2 / jnp.sqrt(v2 + eps)
    s1 = jnp.tile(inv1, W2).reshape(1, W2 * Cmid)
    t1 = jnp.tile(be1 + (b1c - mu1) * inv1, W2).reshape(1, W2 * Cmid)
    s2 = jnp.tile(inv2, W2).reshape(1, W2 * Cout)
    t2 = jnp.tile(be2 + (b2c - mu2) * inv2, W2).reshape(1, W2 * Cout)

    kernel = _make_up_kernel(H, W, Cin, Cmid, Cout)

    grid_spec = pltpu.PrefetchScalarGridSpec(
        num_scalar_prefetch=0,
        grid=(N,),
        in_specs=[
            pl.BlockSpec((1, H, W * Cin), lambda n: (n, 0, 0)),                  # x (folded)
            pl.BlockSpec((3, H2, H), lambda n: (0, 0, 0)),                       # A_h (ky-shifted)
            pl.BlockSpec((3, W * Cin, W2 * Cmid), lambda n: (0, 0, 0)),          # fused up+conv1 W
            pl.BlockSpec((1, W2 * Cmid), lambda n: (0, 0)),                      # bn1 scale
            pl.BlockSpec((1, W2 * Cmid), lambda n: (0, 0)),                      # bn1 shift
            pl.BlockSpec((3, W2 * Cmid, W2 * Cout), lambda n: (0, 0, 0)),        # conv2 banded W
            pl.BlockSpec((1, W2 * Cout), lambda n: (0, 0)),                      # bn2 scale
            pl.BlockSpec((1, W2 * Cout), lambda n: (0, 0)),                      # bn2 shift
        ],
        out_specs=pl.BlockSpec((1, H2, W2 * Cout), lambda n: (n, 0, 0)),         # lane-dense out
        scratch_shapes=[
            pltpu.VMEM((H2 + 2, W2 * Cmid), jnp.float32),                        # H-padded hidden
        ],
    )

    out_f = pl.pallas_call(
        kernel,
        out_shape=jax.ShapeDtypeStruct((N, H2, W2 * Cout), jnp.float32),
        grid_spec=grid_spec,
        compiler_params=pltpu.CompilerParams(dimension_semantics=("parallel",)),
    )(x_f, jnp.asarray(A_sh), C1, s1, t1, B2, s2, t2)

    out_nhwc = out_f.reshape(N, H2, W2, Cout)
    return jnp.transpose(out_nhwc, (0, 3, 1, 2))                                 # back to NCHW


def _ref_forward(x_nchw, params, eps=1e-5):
    """Pure-JAX reference (lax.conv, HIGHEST precision) for correctness checking."""
    N, Cin, H, W = x_nchw.shape
    H2, W2 = 2 * H, 2 * W
    A_h = jnp.asarray(_interp_matrix_align_corners(H, H2))
    A_w = jnp.asarray(_interp_matrix_align_corners(W, W2))

    x = jnp.transpose(x_nchw, (0, 2, 3, 1))                                      # NHWC
    up = jnp.einsum("ph,nhwc->npwc", A_h, x, precision=lax.Precision.HIGHEST)
    up = jnp.einsum("qw,npwc->npqc", A_w, up, precision=lax.Precision.HIGHEST)

    def conv_bn_relu(y, w, b, g, be, mu, var):
        y = lax.conv_general_dilated(
            y, w, (1, 1), "SAME",
            dimension_numbers=("NHWC", "HWIO", "NHWC"),
            precision=lax.Precision.HIGHEST)
        y = (y + b - mu) * (g / jnp.sqrt(var + eps)) + be
        return jnp.maximum(y, 0.0)

    h = conv_bn_relu(up, *params["conv1"])
    o = conv_bn_relu(h, *params["conv2"])
    return jnp.transpose(o, (0, 3, 1, 2))


if __name__ == "__main__":
    # Up(in_channels=4, out_channels=8, bilinear=True); mid_channels = 4 // 2 = 2
    N, in_channels, out_channels = 2, 4, 8
    H = W = 16
    Cin, Cmid, Cout = in_channels, in_channels // 2, out_channels

    key = jax.random.PRNGKey(0)
    ks = jax.random.split(key, 13)

    x = jax.random.normal(ks[0], (N, Cin, H, W), jnp.float32)                    # NCHW like PyTorch

    params = {
        "conv1": (
            0.1 * jax.random.normal(ks[1], (3, 3, Cin, Cmid), jnp.float32),       # HWIO weight
            0.1 * jax.random.normal(ks[2], (Cmid,), jnp.float32),                 # conv bias
            1.0 + 0.1 * jax.random.normal(ks[3], (Cmid,), jnp.float32),           # bn gamma
            0.1 * jax.random.normal(ks[4], (Cmid,), jnp.float32),                 # bn beta
            0.05 * jax.random.normal(ks[5], (Cmid,), jnp.float32),                # running mean
            1.0 + 0.1 * jnp.abs(jax.random.normal(ks[6], (Cmid,), jnp.float32)),  # running var
        ),
        "conv2": (
            0.1 * jax.random.normal(ks[7], (3, 3, Cmid, Cout), jnp.float32),
            0.1 * jax.random.normal(ks[8], (Cout,), jnp.float32),
            1.0 + 0.1 * jax.random.normal(ks[9], (Cout,), jnp.float32),
            0.1 * jax.random.normal(ks[10], (Cout,), jnp.float32),
            0.05 * jax.random.normal(ks[11], (Cout,), jnp.float32),
            1.0 + 0.1 * jnp.abs(jax.random.normal(ks[12], (Cout,), jnp.float32)),
        ),
    }

    out = up_forward(x, params)
    out = jax.block_until_ready(out)
    assert out.shape == (N, out_channels, 2 * H, 2 * W), out.shape

    ref = jax.block_until_ready(_ref_forward(x, params))
    err = float(jnp.max(jnp.abs(out - ref)))
    assert err < 2e-2, f"max abs err {err}"

    print("KERNEL_OK")
</pallas_src>

<mosaic_0001>
module attributes {stable_mosaic.version = 11 : i64} {
  func.func @kernel(%arg0: i32, %arg1: memref<1x16x64xf32, #tpu.memory_space<vmem>>, %arg2: memref<3x32x16xf32, #tpu.memory_space<vmem>>, %arg3: memref<3x64x64xf32, #tpu.memory_space<vmem>>, %arg4: memref<1x64xf32, #tpu.memory_space<vmem>>, %arg5: memref<1x64xf32, #tpu.memory_space<vmem>>, %arg6: memref<3x64x256xf32, #tpu.memory_space<vmem>>, %arg7: memref<1x256xf32, #tpu.memory_space<vmem>>, %arg8: memref<1x256xf32, #tpu.memory_space<vmem>>, %arg9: memref<1x32x256xf32, #tpu.memory_space<vmem>>, %arg10: memref<34x64xf32, #tpu.memory_space<vmem>>) attributes {dimension_semantics = [#tpu.dimension_semantics<parallel>], iteration_bounds = array<i64: 2>, scalar_prefetch = 0 : i64, scratch_operands = 1 : i64, tpu.core_type = #tpu.core_type<tc>, window_params = [{transform_indices = @transform_0, window_bounds = array<i64: 1, 16, 64>}, {pipeline_mode = #tpu.pipeline_mode<synchronous>, transform_indices = @transform_1, window_bounds = array<i64: 3, 32, 16>}, {pipeline_mode = #tpu.pipeline_mode<synchronous>, transform_indices = @transform_2, window_bounds = array<i64: 3, 64, 64>}, {pipeline_mode = #tpu.pipeline_mode<synchronous>, transform_indices = @transform_3, window_bounds = array<i64: 1, 64>}, {pipeline_mode = #tpu.pipeline_mode<synchronous>, transform_indices = @transform_4, window_bounds = array<i64: 1, 64>}, {pipeline_mode = #tpu.pipeline_mode<synchronous>, transform_indices = @transform_5, window_bounds = array<i64: 3, 64, 256>}, {pipeline_mode = #tpu.pipeline_mode<synchronous>, transform_indices = @transform_6, window_bounds = array<i64: 1, 256>}, {pipeline_mode = #tpu.pipeline_mode<synchronous>, transform_indices = @transform_7, window_bounds = array<i64: 1, 256>}, {transform_indices = @transform_8, window_bounds = array<i64: 1, 32, 256>}]} {
    %c0 = arith.constant 0 : index
    %c0_0 = arith.constant 0 : index
    %c0_1 = arith.constant 0 : index
    %0 = vector.load %arg1[%c0, %c0_0, %c0_1] : memref<1x16x64xf32, #tpu.memory_space<vmem>>, vector<1x16x64xf32>
    %1 = vector.shape_cast %0 : vector<1x16x64xf32> to vector<16x64xf32>
    %c0_2 = arith.constant 0 : index
    %c0_3 = arith.constant 0 : index
    %c0_4 = arith.constant 0 : index
    %2 = vector.load %arg3[%c0_2, %c0_3, %c0_4] : memref<3x64x64xf32, #tpu.memory_space<vmem>>, vector<1x64x64xf32>
    %3 = vector.shape_cast %2 : vector<1x64x64xf32> to vector<64x64xf32>
    %cst = arith.constant dense<0.000000e+00> : vector<16x64xf32>
    %4 = tpu.matmul %1, %3, %cst {dimension_numbers = #tpu.dot_dimension_numbers<[1], [0], [0], [1], [0, 0, 1, 1], [], []>} : vector<16x64xf32>, vector<64x64xf32>, vector<16x64xf32> -> vector<16x64xf32>
    %c0_5 = arith.constant 0 : index
    %c0_6 = arith.constant 0 : index
    %c0_7 = arith.constant 0 : index
    %5 = vector.load %arg2[%c0_5, %c0_6, %c0_7] : memref<3x32x16xf32, #tpu.memory_space<vmem>>, vector<1x32x16xf32>
    %6 = vector.shape_cast %5 : vector<1x32x16xf32> to vector<32x16xf32>
    %cst_8 = arith.constant dense<0.000000e+00> : vector<32x64xf32>
    %7 = tpu.matmul %6, %4, %cst_8 {dimension_numbers = #tpu.dot_dimension_numbers<[1], [0], [0], [1], [0, 0, 1, 1], [], []>} : vector<32x16xf32>, vector<16x64xf32>, vector<32x64xf32> -> vector<32x64xf32>
    %c1 = arith.constant 1 : index
    %c0_9 = arith.constant 0 : index
    %c0_10 = arith.constant 0 : index
    %8 = vector.load %arg3[%c1, %c0_9, %c0_10] : memref<3x64x64xf32, #tpu.memory_space<vmem>>, vector<1x64x64xf32>
    %9 = vector.shape_cast %8 : vector<1x64x64xf32> to vector<64x64xf32>
    %cst_11 = arith.constant dense<0.000000e+00> : vector<16x64xf32>
    %10 = tpu.matmul %1, %9, %cst_11 {dimension_numbers = #tpu.dot_dimension_numbers<[1], [0], [0], [1], [0, 0, 1, 1], [], []>} : vector<16x64xf32>, vector<64x64xf32>, vector<16x64xf32> -> vector<16x64xf32>
    %c1_12 = arith.constant 1 : index
    %c0_13 = arith.constant 0 : index
    %c0_14 = arith.constant 0 : index
    %11 = vector.load %arg2[%c1_12, %c0_13, %c0_14] : memref<3x32x16xf32, #tpu.memory_space<vmem>>, vector<1x32x16xf32>
    %12 = vector.shape_cast %11 : vector<1x32x16xf32> to vector<32x16xf32>
    %cst_15 = arith.constant dense<0.000000e+00> : vector<32x64xf32>
    %13 = tpu.matmul %12, %10, %cst_15 {dimension_numbers = #tpu.dot_dimension_numbers<[1], [0], [0], [1], [0, 0, 1, 1], [], []>} : vector<32x16xf32>, vector<16x64xf32>, vector<32x64xf32> -> vector<32x64xf32>
    %14 = arith.addf %7, %13 : vector<32x64xf32>
    %c2 = arith.constant 2 : index
    %c0_16 = arith.constant 0 : index
    %c0_17 = arith.constant 0 : index
    %15 = vector.load %arg3[%c2, %c0_16, %c0_17] : memref<3x64x64xf32, #tpu.memory_space<vmem>>, vector<1x64x64xf32>
    %16 = vector.shape_cast %15 : vector<1x64x64xf32> to vector<64x64xf32>
    %cst_18 = arith.constant dense<0.000000e+00> : vector<16x64xf32>
    %17 = tpu.matmul %1, %16, %cst_18 {dimension_numbers = #tpu.dot_dimension_numbers<[1], [0], [0], [1], [0, 0, 1, 1], [], []>} : vector<16x64xf32>, vector<64x64xf32>, vector<16x64xf32> -> vector<16x64xf32>
    %c2_19 = arith.constant 2 : index
    %c0_20 = arith.constant 0 : index
    %c0_21 = arith.constant 0 : index
    %18 = vector.load %arg2[%c2_19, %c0_20, %c0_21] : memref<3x32x16xf32, #tpu.memory_space<vmem>>, vector<1x32x16xf32>
    %19 = vector.shape_cast %18 : vector<1x32x16xf32> to vector<32x16xf32>
    %cst_22 = arith.constant dense<0.000000e+00> : vector<32x64xf32>
    %20 = tpu.matmul %19, %17, %cst_22 {dimension_numbers = #tpu.dot_dimension_numbers<[1], [0], [0], [1], [0, 0, 1, 1], [], []>} : vector<32x16xf32>, vector<16x64xf32>, vector<32x64xf32> -> vector<32x64xf32>
    %21 = arith.addf %14, %20 : vector<32x64xf32>
    %c0_23 = arith.constant 0 : index
    %c0_24 = arith.constant 0 : index
    %22 = vector.load %arg4[%c0_23, %c0_24] : memref<1x64xf32, #tpu.memory_space<vmem>>, vector<1x64xf32>
    %23 = vector.broadcast %22 : vector<1x64xf32> to vector<32x64xf32>
    %24 = arith.mulf %21, %23 : vector<32x64xf32>
    %c0_25 = arith.constant 0 : index
    %c0_26 = arith.constant 0 : index
    %25 = vector.load %arg5[%c0_25, %c0_26] : memref<1x64xf32, #tpu.memory_space<vmem>>, vector<1x64xf32>
    %26 = vector.broadcast %25 : vector<1x64xf32> to vector<32x64xf32>
    %27 = arith.addf %24, %26 : vector<32x64xf32>
    %cst_27 = arith.constant 0.000000e+00 : f32
    %28 = vector.broadcast %cst_27 : f32 to vector<32x64xf32>
    %29 = arith.maximumf %27, %28 : vector<32x64xf32>
    %cst_28 = arith.constant 0.000000e+00 : f32
    %30 = vector.broadcast %cst_28 : f32 to vector<1x64xf32>
    %c0_29 = arith.constant 0 : index
    %c0_30 = arith.constant 0 : index
    %31 = vector.load %arg10[%c0_29, %c0_30] : memref<34x64xf32, #tpu.memory_space<vmem>>, vector<1x64xf32>
    tpu.vector_store %arg10[%c0_29, %c0_30], %30 {strides = array<i32>} : memref<34x64xf32, #tpu.memory_space<vmem>>, vector<1x64xf32>,
    %cst_31 = arith.constant 0.000000e+00 : f32
    %32 = vector.broadcast %cst_31 : f32 to vector<1x64xf32>
    %c33 = arith.constant 33 : index
    %c0_32 = arith.constant 0 : index
    %33 = vector.load %arg10[%c33, %c0_32] : memref<34x64xf32, #tpu.memory_space<vmem>>, vector<1x64xf32>
    tpu.vector_store %arg10[%c33, %c0_32], %32 {strides = array<i32>} : memref<34x64xf32, #tpu.memory_space<vmem>>, vector<1x64xf32>,
    %c1_33 = arith.constant 1 : index
    %c0_34 = arith.constant 0 : index
    %34 = vector.load %arg10[%c1_33, %c0_34] : memref<34x64xf32, #tpu.memory_space<vmem>>, vector<32x64xf32>
    tpu.vector_store %arg10[%c1_33, %c0_34], %29 {strides = array<i32>} : memref<34x64xf32, #tpu.memory_space<vmem>>, vector<32x64xf32>,
    %c0_35 = arith.constant 0 : index
    %c0_36 = arith.constant 0 : index
    %35 = vector.load %arg10[%c0_35, %c0_36] : memref<34x64xf32, #tpu.memory_space<vmem>>, vector<32x64xf32>
    %c0_37 = arith.constant 0 : index
    %c0_38 = arith.constant 0 : index
    %c0_39 = arith.constant 0 : index
    %36 = vector.load %arg6[%c0_37, %c0_38, %c0_39] : memref<3x64x256xf32, #tpu.memory_space<vmem>>, vector<1x64x256xf32>
    %37 = vector.shape_cast %36 : vector<1x64x256xf32> to vector<64x256xf32>
    %cst_40 = arith.constant dense<0.000000e+00> : vector<32x256xf32>
    %38 = tpu.matmul %35, %37, %cst_40 {dimension_numbers = #tpu.dot_dimension_numbers<[1], [0], [0], [1], [0, 0, 1, 1], [], []>} : vector<32x64xf32>, vector<64x256xf32>, vector<32x256xf32> -> vector<32x256xf32>
    %c1_41 = arith.constant 1 : index
    %c0_42 = arith.constant 0 : index
    %39 = vector.load %arg10[%c1_41, %c0_42] : memref<34x64xf32, #tpu.memory_space<vmem>>, vector<32x64xf32>
    %c1_43 = arith.constant 1 : index
    %c0_44 = arith.constant 0 : index
    %c0_45 = arith.constant 0 : index
    %40 = vector.load %arg6[%c1_43, %c0_44, %c0_45] : memref<3x64x256xf32, #tpu.memory_space<vmem>>, vector<1x64x256xf32>
    %41 = vector.shape_cast %40 : vector<1x64x256xf32> to vector<64x256xf32>
    %cst_46 = arith.constant dense<0.000000e+00> : vector<32x256xf32>
    %42 = tpu.matmul %39, %41, %cst_46 {dimension_numbers = #tpu.dot_dimension_numbers<[1], [0], [0], [1], [0, 0, 1, 1], [], []>} : vector<32x64xf32>, vector<64x256xf32>, vector<32x256xf32> -> vector<32x256xf32>
    %43 = arith.addf %38, %42 : vector<32x256xf32>
    %c2_47 = arith.constant 2 : index
    %c0_48 = arith.constant 0 : index
    %44 = vector.load %arg10[%c2_47, %c0_48] : memref<34x64xf32, #tpu.memory_space<vmem>>, vector<32x64xf32>
    %c2_49 = arith.constant 2 : index
    %c0_50 = arith.constant 0 : index
    %c0_51 = arith.constant 0 : index
    %45 = vector.load %arg6[%c2_49, %c0_50, %c0_51] : memref<3x64x256xf32, #tpu.memory_space<vmem>>, vector<1x64x256xf32>
    %46 = vector.shape_cast %45 : vector<1x64x256xf32> to vector<64x256xf32>
    %cst_52 = arith.constant dense<0.000000e+00> : vector<32x256xf32>
    %47 = tpu.matmul %44, %46, %cst_52 {dimension_numbers = #tpu.dot_dimension_numbers<[1], [0], [0], [1], [0, 0, 1, 1], [], []>} : vector<32x64xf32>, vector<64x256xf32>, vector<32x256xf32> -> vector<32x256xf32>
    %48 = arith.addf %43, %47 : vector<32x256xf32>
    %c0_53 = arith.constant 0 : index
    %c0_54 = arith.constant 0 : index
    %49 = vector.load %arg7[%c0_53, %c0_54] : memref<1x256xf32, #tpu.memory_space<vmem>>, vector<1x256xf32>
    %50 = vector.broadcast %49 : vector<1x256xf32> to vector<32x256xf32>
    %51 = arith.mulf %48, %50 : vector<32x256xf32>
    %c0_55 = arith.constant 0 : index
    %c0_56 = arith.constant 0 : index
    %52 = vector.load %arg8[%c0_55, %c0_56] : memref<1x256xf32, #tpu.memory_space<vmem>>, vector<1x256xf32>
    %53 = vector.broadcast %52 : vector<1x256xf32> to vector<32x256xf32>
    %54 = arith.addf %51, %53 : vector<32x256xf32>
    %cst_57 = arith.constant 0.000000e+00 : f32
    %55 = vector.broadcast %cst_57 : f32 to vector<32x256xf32>
    %56 = arith.maximumf %54, %55 : vector<32x256xf32>
    %c0_58 = arith.constant 0 : index
    %c0_59 = arith.constant 0 : index
    %c0_60 = arith.constant 0 : index
    %57 = vector.load %arg9[%c0_58, %c0_59, %c0_60] : memref<1x32x256xf32, #tpu.memory_space<vmem>>, vector<1x32x256xf32>
    %58 = vector.shape_cast %57 : vector<1x32x256xf32> to vector<32x256xf32>
    %59 = vector.shape_cast %56 : vector<32x256xf32> to vector<1x32x256xf32>
    tpu.vector_store %arg9[%c0_58, %c0_59, %c0_60], %59 {strides = array<i32>} : memref<1x32x256xf32, #tpu.memory_space<vmem>>, vector<1x32x256xf32>,
    return
  }
  func.func @transform_0(%arg0: i32) -> (i32, i32, i32) {
    %c0_i32 = arith.constant 0 : i32
    %c0_i32_0 = arith.constant 0 : i32
    %c0_i32_1 = arith.constant 0 : i32
    return %arg0, %c0_i32, %c0_i32_0 : i32, i32, i32
  }
  func.func @transform_1(%arg0: i32) -> (i32, i32, i32) {
    %c0_i32 = arith.constant 0 : i32
    %c0_i32_0 = arith.constant 0 : i32
    %c0_i32_1 = arith.constant 0 : i32
    %c0_i32_2 = arith.constant 0 : i32
    return %c0_i32, %c0_i32_0, %c0_i32_1 : i32, i32, i32
  }
  func.func @transform_2(%arg0: i32) -> (i32, i32, i32) {
    %c0_i32 = arith.constant 0 : i32
    %c0_i32_0 = arith.constant 0 : i32
    %c0_i32_1 = arith.constant 0 : i32
    %c0_i32_2 = arith.constant 0 : i32
    return %c0_i32, %c0_i32_0, %c0_i32_1 : i32, i32, i32
  }
  func.func @transform_3(%arg0: i32) -> (i32, i32) {
    %c0_i32 = arith.constant 0 : i32
    %c0_i32_0 = arith.constant 0 : i32
    %c0_i32_1 = arith.constant 0 : i32
    return %c0_i32, %c0_i32_0 : i32, i32
  }
  func.func @transform_4(%arg0: i32) -> (i32, i32) {
    %c0_i32 = arith.constant 0 : i32
    %c0_i32_0 = arith.constant 0 : i32
    %c0_i32_1 = arith.constant 0 : i32
    return %c0_i32, %c0_i32_0 : i32, i32
  }
  func.func @transform_5(%arg0: i32) -> (i32, i32, i32) {
    %c0_i32 = arith.constant 0 : i32
    %c0_i32_0 = arith.constant 0 : i32
    %c0_i32_1 = arith.constant 0 : i32
    %c0_i32_2 = arith.constant 0 : i32
    return %c0_i32, %c0_i32_0, %c0_i32_1 : i32, i32, i32
  }
  func.func @transform_6(%arg0: i32) -> (i32, i32) {
    %c0_i32 = arith.constant 0 : i32
    %c0_i32_0 = arith.constant 0 : i32
    %c0_i32_1 = arith.constant 0 : i32
    return %c0_i32, %c0_i32_0 : i32, i32
  }
  func.func @transform_7(%arg0: i32) -> (i32, i32) {
    %c0_i32 = arith.constant 0 : i32
    %c0_i32_0 = arith.constant 0 : i32
    %c0_i32_1 = arith.constant 0 : i32
    return %c0_i32, %c0_i32_0 : i32, i32
  }
  func.func @transform_8(%arg0: i32) -> (i32, i32, i32) {
    %c0_i32 = arith.constant 0 : i32
    %c0_i32_0 = arith.constant 0 : i32
    %c0_i32_1 = arith.constant 0 : i32
    return %arg0, %c0_i32, %c0_i32_0 : i32, i32, i32
  }
}

</mosaic_0001>

<bundles_post_ra>
// kernel: tpu_custom_call.1
= control target key start
LH: loop header
LB: loop body
LE: loop exit
PB: predicated region body
PF: predicated region fallthrough
CT: control target
= control target key end

     0   :  { %13 = vsyncpa [#allocation4], 0  ;;  %s2330_s0 = inlined_call_operand.vmem [shape: f32[2,16,64], index: 0, kind: input, shape index: {}]   ;;  %s2331_s1 = inlined_call_operand.vmem [shape: f32[3,32,16], index: 1, kind: input, shape index: {}]   ;;  %s2332_s2 = inlined_call_operand.hbm [shape: f32[3,64,64], index: 2, kind: input, shape index: {}]   ;;  %s2333_s3 = inlined_call_operand.vmem [shape: f32[1,64], index: 3, kind: input, shape index: {}]   ;;  %s2334_s4 = inlined_call_operand.vmem [shape: f32[1,64], index: 4, kind: input, shape index: {}]   ;;  %s2335_s5 = inlined_call_operand.hbm [shape: f32[3,64,256], index: 5, kind: input, shape index: {}]   ;;  %s2336_s6 = inlined_call_operand.vmem [shape: f32[1,256], index: 6, kind: input, shape index: {}]   ;;  %s2337_s7 = inlined_call_operand.vmem [shape: f32[1,256], index: 7, kind: input, shape index: {}]   ;;  %s2338_s8 = inlined_call_operand.hbm [shape: f32[2,32,256], index: 8, kind: output, shape index: {}]  }
   0x1   :  { %14 = vsyncpa [#allocation7], 0 }
   0x2   :  { %15 = vsyncpa [#allocation5], 0 }
   0x3   :  { %17 = vsyncpa [#allocation5 + $0x1], 0  ;;  %s2039_s27 = smov 0   ;;  %s2041_s28 = smov 0  }
   0x4   :  { %s2043_s29 = smov 0   ;;  %s2045_s30 = smov 0  }
   0x5 LB: > { %2343 = sst [smem:[#allocation12_spill]] %s1978_s29  ;;  %s2060_s9 = sadd.s32 4294967295, %s1982_s30   ;;  %s1982_s30 = sphi %s2045_s30, %s2360_s30   ;;  %s1978_s29 = sphi %s2043_s29, %s2357_s29   ;;  %s1974_s28 = sphi %s2041_s28, %s2359_s28   ;;  %s1970_s27 = sphi %s2039_s27, %s2358_s27  }
   0x6   : > { %s1464_s10 = sadd.s32 4294967294, %s1982_s30   ;;  %s2064_s11 = sadd.s32 1, %s1982_s30  }
   0x7   : > { %s203_s12 = sadd.s32 1, %s1978_s29  ;;  %s200_s13 = ssub.s32 %s1982_s30, %s2064_s11 }
   0x8   : > { %p213_p0 = scmp.ne.s32.totalorder %s1978_s29, %s1974_s28  ;;  %p201_p1 = scmp.eq.s32.totalorder %s200_s13, 0 }
   0x9   : > { %p214_p2 = scmp.eq.s32.totalorder %s2060_s9, 1  ;;  %p219_p3 = scmp.ne.s32.totalorder %s1974_s28, %s1970_s27 }
   0xa   : > { %p220_p4 = scmp.eq.s32.totalorder %s1464_s10, 1  ;;  %p1465_p7 = scmp.ge.s32.totalorder %s1982_s30, 1 }
   0xb   : > { %s2075_s14 = scalar_select %p201_p1, %s1978_s29, %s203_s12  }
   0xc   : > { %p2077_p5 = por %p214_p2, %p213_p0  ;;  %p2081_p6 = por %p220_p4, %p219_p3 }
   0xd   : > { %2344 = sst [smem:[#allocation13_spill]] %s2075_s14  ;;  %p227_p8 = scmp.lt.s32.totalorder %s1982_s30, 3 }
   0xe   : > { %s2345_s15 = scalar_select %p2077_p5, 1, 0 }
   0xf   : > { %s2346_s16 = scalar_select %p2081_p6, 1, 0 }
  0x10   : > { %p2339_p9 = scmp.eq.s32.totalorder %s2060_s9, 0  ;;  %p2088_p10 = pnand %p1465_p7, %p227_p8 }
  0x11   : > { %s1984_s18 = smov [#allocation3]   ;;  %s1985_s21 = smov [#allocation6]  }
  0x12   : > { %s2347_s17 = scalar_select %p2088_p10, 1, 0 }
  0x13   : > { %s242_s19 = sshll.u32 %s1984_s18, 4  ;;  %p1799_p11 = pneg %p2088_p10  ;;  %s243_s19 = int_to_ptr.vmem [resolvable:$true] %s242_s19 }
  0x14   : > { %s261_s22 = sshll.u32 %s1985_s21, 4  ;;  %s1856_s25 = scalar_lea.hbm %s2332_s2, 3072  ;;  %s2100_s22 = int_to_ptr.vmem [resolvable:$true] %s261_s22 }
  0x15   : > { %p2096_p12 = pnand %p2339_p9, %p1799_p11  ;;  %p1857_p13 = scmp.ne.s32.totalorder %s2332_s2, %s1856_s25 }
  0x16   : > { %p1863_p3 = scmp.lt.u32.totalorder %s1856_s25, %s2332_s2 }
  0x17   : > { %p1858_p0 = pneg %p2096_p12 }
  0x19   : > { %p1859_p1 = pnand %p1858_p0, %p1857_p13 }
  0x1b   : > { %p1860_p2 = pneg %p1859_p1 }
  0x1d   : > { %p1865_p4 = pnand %p1863_p3, %p1860_p2 }
  0x1f   : > { %1868 = shalt.err (!%p1865_p4)
}
  0x20   : > { %s1869_s18 = scalar_lea.vmem %s243_s19, 3072  ;;  %p1877_p9 = scmp.lt.s32.totalorder %s243_s19, %s243_s19 }
  0x21   : > { %p1870_p7 = scmp.ne.s32.totalorder %s243_s19, %s1869_s18  ;;  %p1878_p6 = scmp.lt.s32.totalorder %s1869_s18, %s1869_s18 }
  0x23   : > { %p1872_p8 = pnand %p1870_p7, %p1858_p0  ;;  %p1879_p5 = por %p1878_p6, %p1877_p9 }
  0x25   : > { %p1873_p11 = pneg %p1872_p8 }
  0x27   : > { %p1880_p10 = pnand %p1879_p5, %p1873_p11 }
  0x29   : > { %1883 = shalt.err (!%p1880_p10)
}
  0x2a   : > { %s1986_s21 = smov 128   ;;  %s1987_s23 = smov 8  }
  0x2b   : > { %1802 = dma.hbm_to_vmem [thread:$0]  (!%p2096_p12), %s2332_s2, 3072, %s243_s19, [#allocation4], %s1986_s21, %s1986_s21, %s1987_s23  }
  0x2c   : > { %s1884_s12 = scalar_lea.hbm %s2335_s5, 6144 }
  0x2d   : > { %p1885_p13 = scmp.ne.s32.totalorder %s2335_s5, %s1884_s12  ;;  %p1891_p9 = scmp.lt.u32.totalorder %s1884_s12, %s2335_s5 }
  0x2f   : > { %p1887_p5 = pnand %p1885_p13, %p1858_p0 }
  0x31   : > { %p1888_p6 = pneg %p1887_p5 }
  0x33   : > { %p1893_p10 = pnand %p1891_p9, %p1888_p6 }
  0x35   : > { %1896 = shalt.err (!%p1893_p10)
}
  0x36   : > { %s1897_s19 = scalar_lea.vmem %s2100_s22, 6144  ;;  %p1905_p4 = scmp.lt.s32.totalorder %s2100_s22, %s2100_s22 }
  0x37   : > { %p1898_p1 = scmp.ne.s32.totalorder %s2100_s22, %s1897_s19  ;;  %p1906_p7 = scmp.lt.s32.totalorder %s1897_s19, %s1897_s19 }
  0x39   : > { %p1900_p2 = pnand %p1898_p1, %p1858_p0  ;;  %p1907_p8 = por %p1906_p7, %p1905_p4 }
  0x3b   : > { %p1901_p3 = pneg %p1900_p2 }
  0x3d   : > { %p1908_p11 = pnand %p1907_p8, %p1901_p3 }
  0x3f   : > { %1911 = shalt.err (!%p1908_p11)
}
  0x40   : > { %s1988_s29 = smov 256   ;;  %s1989_s14 = smov 16  }
  0x41   : > { %1805 = dma.hbm_to_vmem [thread:$0]  (!%p2096_p12), %s2335_s5, 6144, %s2100_s22, [#allocation7], %s1988_s29, %s1988_s29, %s1989_s14  }
  0x42   : > { %p2349_p13 = scmp.ne.s32.totalorder %s2347_s17, 0 }
  0x43   : > { %p2350_p0 = scmp.eq.s32.totalorder (!%p2349_p13), %s2060_s9, 0 }
  0x44   : > { %291 = sbr.rel (%p2349_p13) target bundleno = 1059 (0x423), region = 52 }
  0x4b   : > { %1957 = dma.done.wait (%p2350_p0), [#allocation4], 3072   ;;  %p2351_p5 = pmov %p2350_p0 }
  0x4c   : > { %p2352_p6 = pmov %p2350_p0 }
  0x4d   : > { %1959 = vsyncadd (%p2351_p5), [#allocation4], 4294964224 }
  0x4e   : > { %1961 = dma.done.wait (%p2352_p6), [#allocation7], 6144   ;;  %p2353_p9 = pmov %p2350_p0 }
  0x4f   : > { %p329_p10 = scmp.lt.s32.totalorder %s2060_s9, 1  ;;  %v336_v0 = vld [vmem:[#allocation3] sm:$0xff]  ;;  %v337_v1 = vld [vmem:[#allocation3 + $0x8] sm:$0xff]  ;;  %v338_v2 = vld [vmem:[#allocation3 + $0x10] sm:$0xff]  ;;  %vm344_vm0 = vcmask 523264   ;;  %vm519_vm1 = vcmask 130048  }
  0x50   : > { %1963 = vsyncadd (%p2353_p9), [#allocation7], 4294961152  ;;  %v1657_v3 = vpack.c.bf16 %v337_v1, %v336_v0  ;;  %v339_v4 = vld [vmem:[#allocation3 + $0x18] sm:$0xff]  ;;  %v340_v6 = vld [vmem:[#allocation3 + $0x20] sm:$0xff]  ;;  %vm930_vm2 = vcmask 516096   ;;  %s326_s12 = sand.u32 1, %s1974_s28  }
  0x51   : > { %s330_s20 = scalar_select %p329_p10, %s2060_s9, 1  ;;  %v1661_v5 = vpack.c.bf16 %v339_v4, %v338_v2  ;;  %v341_v7 = vld [vmem:[#allocation3 + $0x28] sm:$0xff]  ;;  %v342_v10 = vld [vmem:[#allocation3 + $0x30] sm:$0xff]  ;;  %v343_v11 = vld [vmem:[#allocation3 + $0x38] sm:$0xff] }
  0x52   : > { %1658 = vmatprep.subr.bf16.mxu0 %v1657_v3  ;;  %v1665_v9 = vpack.c.bf16 %v341_v7, %v340_v6  ;;  %v1669_v12 = vpack.c.bf16 %v343_v11, %v342_v10  ;;  %v431_v13 = vld [vmem:[#allocation3 + $0x40] sm:$0xff]  ;;  %v432_v14 = vld [vmem:[#allocation3 + $0x48] sm:$0xff]  ;;  %v433_v16 = vld [vmem:[#allocation3 + $0x50] sm:$0xff]  ;;  %s1472_s13 = sshll.u32 %s326_s12, 6  ;;  %s1521_s29 = sshll.u32 %s2060_s9, 10 }
  0x53   : > { %s1520_s22 = sshll.u32 %s330_s20, 4  ;;  %1660 = vmatpush3.bf16.msra.mxu0 %v1657_v3  ;;  %v1673_v15 = vpack.c.bf16 %v432_v14, %v431_v13  ;;  %v434_v17 = vld [vmem:[#allocation3 + $0x58] sm:$0xff]  ;;  %v435_v20 = vld [vmem:[#allocation3 + $0x60] sm:$0xff]  ;;  %v436_v21 = vld [vmem:[#allocation3 + $0x68] sm:$0xff]  ;;  %s2268_s18 = scalar_lea.vmem [#allocation8], %s1472_s13 }
  0x54   : > { %s333_s25 = scalar_lea.vmem %s2330_s0, %s1520_s22  ;;  %1662 = vmatprep.subr.bf16.mxu0 %v1661_v5  ;;  %v1677_v19 = vpack.c.bf16 %v434_v17, %v433_v16  ;;  %v1681_v22 = vpack.c.bf16 %v436_v21, %v435_v20  ;;  %v437_v23 = vld [vmem:[#allocation3 + $0x70] sm:$0xff]  ;;  %v438_v24 = vld [vmem:[#allocation3 + $0x78] sm:$0xff]  ;;  %v715_v27 = vld [vmem:[#allocation3 + $0x80] sm:$0xff]  ;;  %v1990_v17 = vmov 0.0   ;;  %s1380_s19 = sshll.u32 %s2268_s18, 4  ;;  %s2278_s19 = int_to_ptr.vmem [resolvable:$true] %s1380_s19 }
  0x55   : > { %v2164_v8 = vld [vmem:[%s333_s25] sm:$0xff]  ;;  %v335_v18 = vld [vmem:[%s333_s25 + $0x8] sm:$0xff]  ;;  %v1685_v25 = vpack.c.bf16 %v438_v24, %v437_v23  ;;  %v716_v28 = vld [vmem:[#allocation3 + $0x88] sm:$0xff]  ;;  %931 = vst.msk [vmem:[#allocation2] sm:$0x1] %vm930_vm2, %v1990_v17  ;;  %s2283_s23 = scalar_lea.hbm %s2338_s8, %s1521_s29  ;;  %s2289_s20 = scalar_lea.sflag [#allocation5], %s326_s12 }
  0x56   : > { %1586 = vmatprep.mubr.msk.f32.mxu0 %vm344_vm0, %v2164_v8  ;;  %v426_v26 = vld [vmem:[%s2331_s1] sm:$0xff]  ;;  %v1697_v32 = vpack.c.bf16 %v716_v28, %v715_v27  ;;  %v717_v33 = vld [vmem:[#allocation3 + $0x90] sm:$0xff]  ;;  %v427_v35 = vld [vmem:[%s2331_s1 + $0x8] sm:$0xff]  ;;  %932 = vst.msk [vmem:[#allocation2 + $0x21] sm:$0x1] %vm930_vm2, %v1990_v17  ;;  %s1912_s9 = scalar_lea.vmem %s2278_s19, 1024 }
  0x57   : > { %1664 = vmatpush3.bf16.msra.mxu0 %v1661_v5  ;;  %v718_v34 = vld [vmem:[#allocation3 + $0x98] sm:$0xff]  ;;  %v428_v37 = vld [vmem:[%s2331_s1 + $0x10] sm:$0xff]  ;;  %v719_v38 = vld [vmem:[#allocation3 + $0xa0] sm:$0xff]  ;;  %p1913_p12 = scmp.ne.s32.totalorder %s2278_s19, %s1912_s9  ;;  %p2354_p1 = scmp.ne.s32.totalorder %s2345_s15, 0 }
  0x58   : > { %1666 = vmatprep.subr.bf16.mxu0 %v1665_v9  ;;  %v1701_v36 = vpack.c.bf16 %v718_v34, %v717_v33  ;;  %v720_v39 = vld [vmem:[#allocation3 + $0xa8] sm:$0xff]  ;;  %v429_v40 = vld [vmem:[%s2331_s1 + $0x18] sm:$0xff]  ;;  %v722_v43 = vld [vmem:[#allocation3 + $0xb8] sm:$0xff]  ;;  %s1991_s22 = smov [#allocation8]  }
  0x59   : > { %v1705_v41 = vpack.c.bf16 %v720_v39, %v719_v38  ;;  %v721_v42 = vld [vmem:[#allocation3 + $0xb0] sm:$0xff]  ;;  %v1479_v48 = vld [vmem:[%s2331_s1 + $0x20] sm:$0xff]  ;;  %v1480_v50 = vld [vmem:[%s2331_s1 + $0x28] sm:$0xff]  ;;  %p1914_p2 = pnand %p1913_p12, %p2354_p1  ;;  %s1916_s24 = sshll.u32 %s1991_s22, 4  ;;  %s1917_s24 = int_to_ptr.vmem [resolvable:$false] %s1916_s24 }
  0x5a   : > { %v1709_v44 = vpack.c.bf16 %v722_v43, %v721_v42  ;;  %v1493_v49 = vld [vmem:[%s2331_s1 + $0x40] sm:$0xff]  ;;  %1612 = vmatprep.mubr.msk.f32.mxu1 %vm519_vm1, %v1479_v48  ;;  %v1481_v51 = vld [vmem:[%s2331_s1 + $0x30] sm:$0xff]  ;;  %v1482_v52 = vld [vmem:[%s2331_s1 + $0x38] sm:$0xff]  ;;  %s1918_s17 = scalar_lea.vmem %s1917_s24, 2048  ;;  %p1919_p4 = scmp.lt.s32.totalorder %s2278_s19, %s1917_s24 }
  0x5b   : > { %1668 = vmatpush3.bf16.msra.mxu0 %v1665_v9  ;;  %v1494_v56 = vld [vmem:[%s2331_s1 + $0x48] sm:$0xff]  ;;  %v1495_v57 = vld [vmem:[%s2331_s1 + $0x50] sm:$0xff]  ;;  %v1496_v58 = vld [vmem:[%s2331_s1 + $0x58] sm:$0xff]  ;;  %p1915_p3 = pneg %p1914_p2  ;;  %p1920_p7 = scmp.lt.s32.totalorder %s1918_s17, %s1912_s9 }
  0x5c   : > { %1670 = vmatprep.subr.bf16.mxu0 %v1669_v12  ;;  %v963_v60 = vld [vmem:[#allocation6 + $0x88] sm:$0xff]  ;;  %v965_v61 = vld [vmem:[#allocation6 + $0x98] sm:$0xff]  ;;  %v962_v0 = vld [vmem:[#allocation6 + $0x80] sm:$0xff] }
  0x5d   : > { %v1717_v63 = vpack.c.bf16 %v965_v61, %v963_v60  ;;  %v964_v1 = vld [vmem:[#allocation6 + $0x90] sm:$0xff]  ;;  %v967_v3 = vld [vmem:[#allocation6 + $0xa8] sm:$0xff]  ;;  %v969_v4 = vld [vmem:[#allocation6 + $0xb8] sm:$0xff]  ;;  %p1921_p8 = por %p1920_p7, %p1919_p4 }
  0x5e   : > { %v1719_v2 = vpack.c.bf16 %v964_v1, %v962_v0  ;;  %v1721_v6 = vpack.c.bf16 %v969_v4, %v967_v3  ;;  %v966_v7 = vld [vmem:[#allocation6 + $0xa0] sm:$0xff]  ;;  %v971_v11 = vld [vmem:[#allocation6 + $0xc8] sm:$0xff]  ;;  %v1501_v28 = vld [vmem:[%s2333_s3] ss:$0 sm:$0xff] }
  0x5f   : > { %1672 = vmatpush3.bf16.msra.mxu0 %v1669_v12  ;;  %v973_v12 = vld [vmem:[#allocation6 + $0xd8] sm:$0xff]  ;;  %v970_v14 = vld [vmem:[#allocation6 + $0xc0] sm:$0xff]  ;;  %v942_v24 = vld [vmem:[#allocation6 + $0x8] sm:$0xff]  ;;  %p1922_p11 = pnand %p1921_p8, %p1915_p3 }
  0x60   : > { %1674 = vmatprep.subr.bf16.mxu0 %v1673_v15  ;;  %v1725_v13 = vpack.c.bf16 %v973_v12, %v971_v11  ;;  %v974_v21 = vld [vmem:[#allocation6 + $0xe0] sm:$0xff]  ;;  %v954_v1 = vld [vmem:[#allocation6 + $0x68] sm:$0xff] }
  0x61   : > { %v1185_v12 = vld [vmem:[#allocation6 + $0x100] sm:$0xff] }
  0x62   : > { %1587 = vmatmul.mubr.msk.f32.vlgmr.msra.gmra.mrb[0].mxu0 %vm344_vm0, %v335_v18 }
  0x63   : > { %1676 = vmatpush3.bf16.msra.mxu0 %v1673_v15  ;;  %1605 = vmatprep.mubr.msk.f32.mxu0 %vm344_vm0, %v2164_v8  ;;  %v972_v15 = vld [vmem:[#allocation6 + $0xd0] sm:$0xff] }
  0x64   : > { %1678 = vmatprep.subr.bf16.mxu0 %v1677_v19  ;;  %v1727_v16 = vpack.c.bf16 %v972_v15, %v970_v14  ;;  %v1190_v15 = vld [vmem:[#allocation6 + $0x128] sm:$0xff] }
  0x67   : > { %1680 = vmatpush3.bf16.msra.mxu0 %v1677_v19  ;;  %v977_v19 = vld [vmem:[#allocation6 + $0xf8] sm:$0xff] }
  0x68   : > { %1682 = vmatprep.subr.bf16.mxu0 %v1681_v22 }
  0x6b   : > { %1684 = vmatpush3.bf16.msra.mxu0 %v1681_v22  ;;  %v976_v22 = vld [vmem:[#allocation6 + $0xf0] sm:$0xff] }
  0x6c   : > { %1686 = vmatprep.subr.bf16.mxu0 %v1685_v25  ;;  %v1731_v23 = vpack.c.bf16 %v976_v22, %v974_v21  ;;  %v1191_v21 = vld [vmem:[#allocation6 + $0x130] sm:$0xff] }
  0x6f   : > { %1688 = vmatpush3.bf16.msra.mxu0 %v1685_v25  ;;  %v944_v25 = vld [vmem:[#allocation6 + $0x18] sm:$0xff] }
  0x72   : > { %1606 = vmatmul.mubr.msk.f32.vlgmr.msra.gmra.mrb[2].mxu0 %vm344_vm0, %v335_v18 }
  0x73   : > { %1622 = vmatprep.mubr.msk.f32.mxu0 %vm519_vm1, %v426_v26  ;;  %v1733_v26 = vpack.c.bf16 %v944_v25, %v942_v24  ;;  %v1196_v24 = vld [vmem:[#allocation6 + $0x158] sm:$0xff] }
 0x135   : > { %v1588_v29 = vpop.f32.mrb[0].mxu0 }
 0x136   : > { %v417_v30 = vpop.f32.mrb[1].mxu0 }
 0x137   : > { %v1693_v31 = vpack.c.bf16 %v1588_v29, %v417_v30 }
 0x139   : > { %1694 = vmatprep.subr.bf16.mxu0 %v1693_v31 }
 0x13a   : > { %1696 = vmatpush3.bf16.msra.mxu0 %v1693_v31  ;;  %v1502_v31 = vld [vmem:[%s2334_s4] ss:$0 sm:$0xff] }
 0x13b   : > { %1698 = vmatprep.subr.bf16.mxu0 %v1697_v32 }
 0x13d   : > { %1623 = vmatmul.mubr.msk.f32.vlgmr.msra.gmra.mrb[4].mxu0 %vm519_vm1, %v427_v35 }
 0x13e   : > { %1700 = vmatpush3.bf16.msra.mxu0 %v1697_v32  ;;  %1625 = vmatprep.mubr.msk.f32.mxu0 %vm519_vm1, %v428_v37 }
 0x13f   : > { %1702 = vmatprep.subr.bf16.mxu0 %v1701_v36 }
 0x141   : > { %1626 = vmatmul.mubr.msk.f32.gmra.mrb[6].mxu0 %vm519_vm1, %v429_v40 }
 0x142   : > { %1704 = vmatpush3.bf16.msra.mxu0 %v1701_v36  ;;  %1644 = vmatprep.mubr.msk.f32.mxu0 %vm344_vm0, %v2164_v8  ;;  %v968_v8 = vld [vmem:[#allocation6 + $0xb0] sm:$0xff] }
 0x143   : > { %1706 = vmatprep.subr.bf16.mxu0 %v1705_v41  ;;  %v1723_v10 = vpack.c.bf16 %v968_v8, %v966_v7  ;;  %v1186_v8 = vld [vmem:[#allocation6 + $0x108] sm:$0xff] }
 0x145   : > { %v1607_v45 = vpop.f32.mrb[2].mxu0 }
 0x146   : > { %1708 = vmatpush3.bf16.msra.mxu0 %v1705_v41  ;;  %v505_v46 = vpop.f32.mrb[3].mxu0 }
 0x147   : > { %1710 = vmatprep.subr.bf16.mxu0 %v1709_v44  ;;  %v1689_v47 = vpack.c.bf16 %v1607_v45, %v505_v46 }
 0x149   : > { %1690 = vmatprep.subr.bf16.mxu1 %v1689_v47 }
 0x14a   : > { %1712 = vmatpush3.bf16.msra.mxu0 %v1709_v44  ;;  %1692 = vmatpush3.bf16.msra.mxu1 %v1689_v47 }
 0x14b   : > { %1718 = vmatprep.subr.bf16.mxu1 %v1717_v63  ;;  %v951_v63 = vld [vmem:[#allocation6 + $0x50] sm:$0xff] }
 0x14d   : > { %1645 = vmatmul.mubr.msk.f32.vlgmr.msra.gmra.mrb[8].mxu0 %vm344_vm0, %v335_v18  ;;  %1613 = vmatmul.mubr.msk.f32.vlgmr.msra.gmra.mrb[0].mxu1 %vm519_vm1, %v1480_v50  ;;  %v975_v18 = vld [vmem:[#allocation6 + $0xe8] sm:$0xff]  ;;  %v943_v50 = vld [vmem:[#allocation6 + $0x10] sm:$0xff] }
 0x14e   : > { %1651 = vmatprep.mubr.msk.f32.mxu0 %vm519_vm1, %v1493_v49  ;;  %1615 = vmatprep.mubr.msk.f32.mxu1 %vm519_vm1, %v1481_v51  ;;  %v1729_v20 = vpack.c.bf16 %v977_v19, %v975_v18  ;;  %v941_v49 = vld [vmem:[#allocation6] sm:$0xff]  ;;  %v946_v51 = vld [vmem:[#allocation6 + $0x28] sm:$0xff] }
 0x14f   : > { %1720 = vmatpush1.bf16.msra.mxu1 %v1719_v2  ;;  %v956_v2 = vld [vmem:[#allocation6 + $0x78] sm:$0xff] }
 0x150   : > { %1722 = vmatprep.subr.bf16.mxu1 %v1721_v6  ;;  %v1745_v4 = vpack.c.bf16 %v956_v2, %v954_v1  ;;  %v955_v6 = vld [vmem:[#allocation6 + $0x70] sm:$0xff] }
 0x151   : > { %1616 = vmatmul.mubr.msk.f32.gmra.mrb[2].mxu1 %vm519_vm1, %v1482_v52  ;;  %v948_v52 = vld [vmem:[#allocation6 + $0x38] sm:$0xff] }
 0x152   : > { %1054 = vmatprep.mubr.f32.mxu1 %v1990_v17 }
 0x153   : > { %1724 = vmatpush1.bf16.msra.mxu1 %v1723_v10 }
 0x154   : > { %1726 = vmatprep.subr.bf16.mxu1 %v1725_v13  ;;  %v1187_v13 = vld [vmem:[#allocation6 + $0x110] sm:$0xff] }
 0x155   : > { %v1751_v18 = vpack.c.bf16 %v1187_v13, %v1185_v12 }
 0x157   : > { %1728 = vmatpush1.bf16.msra.mxu1 %v1727_v16  ;;  %v1192_v16 = vld [vmem:[#allocation6 + $0x138] sm:$0xff] }
 0x158   : > { %1730 = vmatprep.subr.bf16.mxu1 %v1729_v20  ;;  %v1753_v19 = vpack.c.bf16 %v1192_v16, %v1190_v15  ;;  %v1189_v20 = vld [vmem:[#allocation6 + $0x120] sm:$0xff] }
 0x159   : > { %v1755_v25 = vpack.c.bf16 %v1191_v21, %v1189_v20 }
 0x15b   : > { %1732 = vmatpush1.bf16.msra.mxu1 %v1731_v23  ;;  %v1194_v23 = vld [vmem:[#allocation6 + $0x148] sm:$0xff] }
 0x15c   : > { %1734 = vmatprep.subr.bf16.mxu1 %v1733_v26  ;;  %v1757_v26 = vpack.c.bf16 %v1196_v24, %v1194_v23 }
 0x220   : > { %v1646_v53 = vpop.f32.mrb[8].mxu0  ;;  %v1614_v59 = vpop.f32.mrb[0].mxu1 }
 0x221   : > { %v789_v54 = vpop.f32.mrb[9].mxu0  ;;  %v598_v62 = vpop.f32.mrb[1].mxu1 }
 0x222   : > { %v1713_v55 = vpack.c.bf16 %v1646_v53, %v789_v54  ;;  %v1735_v53 = vpack.c.bf16 %v943_v50, %v941_v49  ;;  %v1737_v54 = vpack.c.bf16 %v948_v52, %v946_v51 }
 0x224   : > { %1714 = vmatprep.subr.bf16.mxu0 %v1713_v55  ;;  %v1617_v5 = vpop.f32.mrb[2].mxu1 }
 0x225   : > { %1716 = vmatpush3.bf16.msra.mxu0 %v1713_v55  ;;  %v608_v9 = vpop.f32.mrb[3].mxu1  ;;  %v945_v55 = vld [vmem:[#allocation6 + $0x20] sm:$0xff] }
 0x228   : > { %1652 = vmatmul.mubr.msk.f32.vlgmr.msra.gmra.mrb[4].mxu0 %vm519_vm1, %v1494_v56  ;;  %v947_v56 = vld [vmem:[#allocation6 + $0x30] sm:$0xff] }
 0x229   : > { %1654 = vmatprep.mubr.msk.f32.mxu0 %vm519_vm1, %v1495_v57  ;;  %v1739_v60 = vpack.c.bf16 %v947_v56, %v945_v55 }
 0x22c   : > { %1655 = vmatmul.mubr.msk.f32.gmra.mrb[6].mxu0 %vm519_vm1, %v1496_v58  ;;  %v950_v58 = vld [vmem:[#allocation6 + $0x48] sm:$0xff] }
 0x2fb   : > { %v1653_v27 = vpop.f32.mrb[4].mxu0 }
 0x2fc   : > { %v1765_v29 = vadd.f32 %v1653_v27, %v1614_v59  ;;  %v881_v30 = vpop.f32.mrb[5].mxu0  ;;  %v952_v59 = vld [vmem:[#allocation6 + $0x58] sm:$0xff]  ;;  %v1193_v27 = vld [vmem:[#allocation6 + $0x140] sm:$0xff] }
 0x2fd   : > { %v1766_v32 = vadd.f32 %v881_v30, %v598_v62  ;;  %v1741_v61 = vpack.c.bf16 %v952_v59, %v950_v58  ;;  %v949_v62 = vld [vmem:[#allocation6 + $0x40] sm:$0xff]  ;;  %v1198_v30 = vld [vmem:[#allocation6 + $0x168] sm:$0xff] }
 0x2fe   : > { %v912_v33 = vmul.f32 %v1765_v29, %v1501_v28  ;;  %v1743_v3 = vpack.c.bf16 %v951_v63, %v949_v62 }
 0x2ff   : > { %v911_v34 = vmul.f32 %v1766_v32, %v1501_v28  ;;  %v1656_v35 = vpop.f32.mrb[6].mxu0 }
 0x300   : > { %v923_v36 = vadd.f32 %v1502_v31, %v912_v33  ;;  %v1767_v37 = vadd.f32 %v1656_v35, %v1617_v5  ;;  %v891_v38 = vpop.f32.mrb[7].mxu0  ;;  %v953_v5 = vld [vmem:[#allocation6 + $0x60] sm:$0xff]  ;;  %v1199_v35 = vld [vmem:[#allocation6 + $0x170] sm:$0xff] }
 0x301   : > { %v922_v39 = vadd.f32 %v1502_v31, %v911_v34  ;;  %v1768_v40 = vadd.f32 %v891_v38, %v608_v9  ;;  %v1188_v9 = vld [vmem:[#allocation6 + $0x118] sm:$0xff]  ;;  %v1747_v10 = vpack.c.bf16 %v955_v6, %v953_v5  ;;  %v1197_v34 = vld [vmem:[#allocation6 + $0x160] sm:$0xff] }
 0x302   : > { %v927_v41 = vmax.f32 %v923_v36, 0.0  ;;  %v914_v42 = vmul.f32 %v1767_v37, %v1501_v28  ;;  %v1749_v11 = vpack.c.bf16 %v1188_v9, %v1186_v8  ;;  %v1763_v37 = vpack.c.bf16 %v1199_v35, %v1197_v34 }
 0x303   : > { %v926_v43 = vmax.f32 %v922_v39, 0.0  ;;  %v913_v44 = vmul.f32 %v1768_v40, %v1501_v28  ;;  %v1195_v28 = vld [vmem:[#allocation6 + $0x150] sm:$0xff] }
 0x304   : > { %934 = vst.msk [vmem:[#allocation2 + $0x9] sm:$0xff] %vm344_vm0, %v927_v41  ;;  %v925_v45 = vadd.f32 %v1502_v31, %v914_v42  ;;  %v1759_v32 = vpack.c.bf16 %v1195_v28, %v1193_v27 }
 0x305   : > { %933 = vst.msk [vmem:[#allocation2 + $0x1] sm:$0xff] %vm344_vm0, %v926_v43  ;;  %v924_v46 = vadd.f32 %v1502_v31, %v913_v44  ;;  %v1200_v31 = vld [vmem:[#allocation6 + $0x178] sm:$0xff]  ;;  %v1312_v43 = vlaneseq }
 0x306   : > { %v929_v47 = vmax.f32 %v925_v45, 0.0  ;;  %v1761_v33 = vpack.c.bf16 %v1200_v31, %v1198_v30 }
 0x307   : > { %v928_v48 = vmax.f32 %v924_v46, 0.0  ;;  %v1313_v44 = vshrl.u32 %v1312_v43, 7  ;;  %v1310_v46 = vld [vmem:[%s2336_s6] sm:$0x3] }
 0x308   : > { %936 = vst.msk [vmem:[#allocation2 + $0x19] sm:$0xff] %vm344_vm0, %v929_v47 }
 0x309   : > { %935 = vst.msk [vmem:[#allocation2 + $0x11] sm:$0xff] %vm344_vm0, %v928_v48  ;;  %v1314_v45 = vsub.s32 0, %v1313_v44  ;;  %v1318_v47 = vsub.s32 1, %v1313_v44  ;;  %v1330_v48 = vld [vmem:[%s2337_s7] sm:$0x3] }
 0x30b   : > { %v958_v0 = vld [vmem:[#allocation2 + $0x9] sm:$0xff]  ;;  %v1315_v49 = vrot.slane %v1310_v46, %v1314_v45  ;;  %v1319_v50 = vrot.slane %v1310_v46, %v1318_v47  ;;  %v1335_v51 = vrot.slane %v1330_v48, %v1314_v45  ;;  %v1339_v52 = vrot.slane %v1330_v48, %v1318_v47 }
 0x30c   : > { %v957_v57 = vld [vmem:[#allocation2 + $0x1] sm:$0xff] }
 0x30d   : > { %1503 = vmatmul.mubr.msk.f32.vlgmr.msra.gmra.mrb[4].mxu1 %vm344_vm0, %v957_v57  ;;  %v937_v22 = vld [vmem:[#allocation2] sm:$0xff]  ;;  %v938_v29 = vld [vmem:[#allocation2 + $0x8] sm:$0xff] }
 0x30e   : > { %1736 = vmatpush1.bf16.msra.mxu1 %v1735_v53  ;;  %1060 = vmatprep.mubr.f32.mxu1 %v1990_v17  ;;  %v1180_v39 = vld [vmem:[#allocation2 + $0x2] sm:$0xff] }
 0x30f   : > { %1738 = vmatprep.subr.bf16.mxu1 %v1737_v54  ;;  %v960_v14 = vld [vmem:[#allocation2 + $0x19] sm:$0xff] }
 0x310   : > { %v959_v7 = vld [vmem:[#allocation2 + $0x11] sm:$0xff]  ;;  %v1183_v42 = vld [vmem:[#allocation2 + $0x1a] sm:$0xff] }
 0x311   : > { %1504 = vmatmul.mubr.msk.f32.gmra.mrb[6].mxu1 %vm344_vm0, %v958_v0  ;;  %v939_v36 = vld [vmem:[#allocation2 + $0x10] sm:$0xff]  ;;  %v940_v38 = vld [vmem:[#allocation2 + $0x18] sm:$0xff] }
 0x312   : > { %1740 = vmatpush1.bf16.msra.mxu1 %v1739_v60  ;;  %1066 = vmatprep.mubr.f32.mxu1 %v1990_v17  ;;  %v1181_v40 = vld [vmem:[#allocation2 + $0xa] sm:$0xff]  ;;  %v1182_v41 = vld [vmem:[#allocation2 + $0x12] sm:$0xff] }
 0x313   : > { %1742 = vmatprep.subr.bf16.mxu1 %v1741_v61 }
 0x315   : > { %1505 = vmatmul.mubr.msk.f32.gmra.mrb[8].mxu1 %vm344_vm0, %v959_v7 }
 0x316   : > { %1744 = vmatpush1.bf16.msra.mxu1 %v1743_v3  ;;  %1072 = vmatprep.mubr.f32.mxu1 %v1990_v17 }
 0x317   : > { %1746 = vmatprep.subr.bf16.mxu1 %v1745_v4 }
 0x319   : > { %1506 = vmatmul.mubr.msk.f32.gmra.mrb[10].mxu1 %vm344_vm0, %v960_v14 }
 0x31a   : > { %1748 = vmatpush1.bf16.msra.mxu1 %v1747_v10  ;;  %1155 = vmatprep.mubr.f32.mxu1 %v1990_v17 }
 0x31b   : > { %1750 = vmatprep.subr.bf16.mxu1 %v1749_v11 }
 0x31d   : > { %1507 = vmatmul.mubr.msk.f32.vlgmr.msra.gmra.mrb[4].mxu1 %vm344_vm0, %v937_v22 }
 0x31e   : > { %1752 = vmatpush1.bf16.msra.mxu1 %v1751_v18  ;;  %1161 = vmatprep.mubr.f32.mxu1 %v1990_v17 }
 0x31f   : > { %1754 = vmatprep.subr.bf16.mxu1 %v1753_v19 }
 0x321   : > { %1508 = vmatmul.mubr.msk.f32.gmra.mrb[6].mxu1 %vm344_vm0, %v938_v29 }
 0x322   : > { %1756 = vmatpush1.bf16.msra.mxu1 %v1755_v25  ;;  %1167 = vmatprep.mubr.f32.mxu1 %v1990_v17 }
 0x323   : > { %1758 = vmatprep.subr.bf16.mxu1 %v1757_v26 }
 0x325   : > { %1509 = vmatmul.mubr.msk.f32.gmra.mrb[8].mxu1 %vm344_vm0, %v939_v36 }
 0x326   : > { %1760 = vmatpush1.bf16.msra.mxu1 %v1759_v32  ;;  %1173 = vmatprep.mubr.f32.mxu1 %v1990_v17 }
 0x327   : > { %1762 = vmatprep.subr.bf16.mxu1 %v1761_v33 }
 0x329   : > { %1510 = vmatmul.mubr.msk.f32.gmra.mrb[10].mxu1 %vm344_vm0, %v940_v38 }
 0x32a   : > { %1764 = vmatpush1.bf16.msra.mxu1 %v1763_v37  ;;  %1277 = vmatprep.mubr.f32.mxu1 %v1990_v17 }
 0x32d   : > { %1511 = vmatmul.mubr.msk.f32.vlgmr.msra.gmra.mrb[4].mxu1 %vm344_vm0, %v1180_v39 }
 0x32e   : > { %1283 = vmatprep.mubr.f32.mxu1 %v1990_v17 }
 0x331   : > { %1512 = vmatmul.mubr.msk.f32.gmra.mrb[6].mxu1 %vm344_vm0, %v1181_v40 }
 0x332   : > { %1289 = vmatprep.mubr.f32.mxu1 %v1990_v17 }
 0x335   : > { %1513 = vmatmul.mubr.msk.f32.gmra.mrb[8].mxu1 %vm344_vm0, %v1182_v41 }
 0x336   : > { %1295 = vmatprep.mubr.f32.mxu1 %v1990_v17 }
 0x339   : > { %1514 = vmatmul.mubr.msk.f32.gmra.mrb[10].mxu1 %vm344_vm0, %v1183_v42 }
 0x400   : > { %v1279_v17 = vpop.f32.mrb[4].mxu1 }
 0x401   : > { %v1322_v53 = vmul.f32 %v1315_v49, %v1279_v17  ;;  %v1281_v54 = vpop.f32.mrb[5].mxu1 }
 0x402   : > { %v1323_v55 = vmul.f32 %v1319_v50, %v1281_v54 }
 0x403   : > { %v1342_v56 = vadd.f32 %v1335_v51, %v1322_v53 }
 0x404   : > { %v1343_v57 = vadd.f32 %v1339_v52, %v1323_v55  ;;  %v1285_v58 = vpop.f32.mrb[6].mxu1 }
 0x405   : > { %v1350_v59 = vmax.f32 %v1342_v56, 0.0  ;;  %v1324_v60 = vmul.f32 %v1315_v49, %v1285_v58  ;;  %v1287_v61 = vpop.f32.mrb[7].mxu1 }
 0x406   : > { %v1351_v62 = vmax.f32 %v1343_v57, 0.0  ;;  %v1325_v63 = vmul.f32 %v1319_v50, %v1287_v61 }
 0x407   : > { %1358 = vst [vmem:[%s2268_s18] sm:$0xff] %v1350_v59  ;;  %v1344_v0 = vadd.f32 %v1335_v51, %v1324_v60 }
 0x408   : > { %1359 = vst [vmem:[%s2268_s18 + $0x8] sm:$0xff] %v1351_v62  ;;  %v1345_v1 = vadd.f32 %v1339_v52, %v1325_v63  ;;  %v1291_v2 = vpop.f32.mrb[8].mxu1 }
 0x409   : > { %v1352_v3 = vmax.f32 %v1344_v0, 0.0  ;;  %v1326_v4 = vmul.f32 %v1315_v49, %v1291_v2  ;;  %v1293_v5 = vpop.f32.mrb[9].mxu1 }
 0x40a   : > { %v1353_v6 = vmax.f32 %v1345_v1, 0.0  ;;  %v1327_v7 = vmul.f32 %v1319_v50, %v1293_v5 }
 0x40b   : > { %1360 = vst [vmem:[%s2268_s18 + $0x10] sm:$0xff] %v1352_v3  ;;  %v1346_v8 = vadd.f32 %v1335_v51, %v1326_v4 }
 0x40c   : > { %1361 = vst [vmem:[%s2268_s18 + $0x18] sm:$0xff] %v1353_v6  ;;  %v1347_v9 = vadd.f32 %v1339_v52, %v1327_v7  ;;  %v1297_v10 = vpop.f32.mrb[10].mxu1 }
 0x40d   : > { %v1354_v11 = vmax.f32 %v1346_v8, 0.0  ;;  %v1328_v12 = vmul.f32 %v1315_v49, %v1297_v10  ;;  %v1299_v13 = vpop.f32.mrb[11].mxu1 }
 0x40e   : > { %v1355_v14 = vmax.f32 %v1347_v9, 0.0  ;;  %v1329_v15 = vmul.f32 %v1319_v50, %v1299_v13 }
 0x40f   : > { %1362 = vst [vmem:[%s2268_s18 + $0x20] sm:$0xff] %v1354_v11  ;;  %v1348_v16 = vadd.f32 %v1335_v51, %v1328_v12 }
 0x410   : > { %1363 = vst [vmem:[%s2268_s18 + $0x28] sm:$0xff] %v1355_v14  ;;  %v1349_v18 = vadd.f32 %v1339_v52, %v1329_v15 }
 0x411   : > { %v1356_v19 = vmax.f32 %v1348_v16, 0.0 }
 0x412   : > { %v1357_v20 = vmax.f32 %v1349_v18, 0.0 }
 0x413   : > { %1364 = vst [vmem:[%s2268_s18 + $0x30] sm:$0xff] %v1356_v19 }
 0x414   : > { %1365 = vst [vmem:[%s2268_s18 + $0x38] sm:$0xff] %v1357_v20 }
 0x415   : > { %1925 = shalt.err (!%p1922_p11)
}
 0x416   : > { %s1926_s25 = scalar_lea.hbm %s2283_s23, 1024  ;;  %s1930_s12 = scalar_lea.hbm %s2338_s8, 2048 }
 0x417   : > { %p1927_p13 = scmp.ne.s32.totalorder %s2283_s23, %s1926_s25  ;;  %p1931_p6 = scmp.lt.u32.totalorder %s2283_s23, %s2338_s8 }
 0x418   : > { %p1932_p9 = scmp.lt.u32.totalorder %s1930_s12, %s1926_s25  ;;  %p1934_p12 = scmp.lt.u32.totalorder %s1926_s25, %s2283_s23 }
 0x419   : > { %p1928_p0 = pnand %p1927_p13, %p2354_p1 }
 0x41a   : > { %p1933_p10 = por %p1932_p9, %p1931_p6 }
 0x41b   : > { %p1929_p5 = pneg %p1928_p0 }
 0x41c   : > { %p1935_p2 = por %p1934_p12, %p1933_p10 }
 0x41e   : > { %p1936_p3 = pnand %p1935_p2, %p1929_p5 }
 0x420   : > { %1939 = shalt.err (!%p1936_p3)
}
 0x421   : > { %s1992_s29 = smov 256   ;;  %s1993_s14 = smov 16  }
 0x422   : > { %1797 = dma.vmem_to_hbm [thread:$0]  (%p2354_p1), %s2278_s19, 1024, %s2283_s23, %s2289_s20, %s1992_s29, %s1992_s29, %s1993_s14  }
 0x423 PF: > { %p1814_p4 = scmp.ge.s32.totalorder %s1982_s30, 2  ;;  %s1395_s21 = sand.u32 1, %s1970_s27  }
 0x424   : > { %p2355_p7 = scmp.ne.s32.totalorder %s2346_s16, 0  ;;  %s1396_s9 = scalar_lea.sflag [#allocation5], %s1395_s21 }
 0x426   : > { %p1807_p8 = pnand %p1814_p4, %p2355_p7 }
 0x428   : > { %1965 = dma.done.wait (!%p1807_p8), %s1396_s9, 1024  }
 0x429   : > { %1967 = vsyncadd (!%p1807_p8), %s1396_s9, 4294966272  ;;  %s2356_s22 = sld [smem:[#allocation12_spill]]  ;;  %s2357_s29 = sld [smem:[#allocation13_spill]] }
 0x42a   : > { %p20_p11 = scmp.ge.s32.totalorder %s2064_s11, 4   ;;  %s2358_s27 = smov %s1974_s28 }
 0x42b   : > { %s2360_s30 = smov %s2064_s11 }
 0x42c   :  { %22 = sbr.rel (!%p20_p11) target bundleno = 5 (0x5), region = 102 }
 0x42f   : > { %s2359_s28 = smov %s2356_s22 }
 0x433   :  { %1401 = vsyncpa [#allocation4], 1 }
 0x434   :  { %1403 = vsyncpa [#allocation4 + $0x1], 1 }
 0x435   :  { %1404 = vsyncpa [#allocation7], 1 }
 0x436   :  { %1405 = vsyncpa [#allocation5], 1 }
 0x437   :  { %1407 = vsyncpa [#allocation5 + $0x1], 1 }

</bundles_post_ra>
